<compile_context>
chip_gen: v6e
topology: v6e:2x2x1
jax: 0.10.0
libtpu: 0.0.40
codegen_flags: <defaults>
</compile_context>

<pallas_src>
import functools

import jax
import jax.numpy as jnp
from jax.experimental import pallas as pl
from jax.experimental.pallas import tpu as pltpu


def fuse_weights(wq, wk, wv):
    """Fuse per-head Q/K/V weights into one (H, d_in, 3*d_out) tensor.

    The softmax scale 1 / d_out**0.05 (the reference divides scores by
    keys.shape[-1] ** 0.05) is folded into the Q columns so the kernel never
    rescales the scores tensor. Call ONCE outside the hot path.
    """
    d_out = wq.shape[-1]
    inv_scale = 1.0 / (float(d_out) ** 0.05)
    return jnp.concatenate([wq * inv_scale, wk, wv], axis=-1)


def _mha_kernel(x_ref, w_ref, o_ref, *, H, d_out, mxu_dtype):
    # x_ref: (1, T, d_in)        one batch element (grid over B)
    # w_ref: (H, d_in, 3*d_out)  fused per-head [Q*scale | K | V] weights
    # o_ref: (1, T, H*d_out)     head-interleaved output (== torch.cat(..., dim=-1))
    x = x_ref[0].astype(mxu_dtype)                    # (T, d_in)
    xh = jnp.broadcast_to(x, (H,) + x.shape)          # (H, T, d_in): heads as batch dim

    # One batched MXU contraction for every head's Q, K and V projection
    # (f32 accumulation; operands optionally bf16 for MXU throughput).
    qkv = jnp.einsum('htd,hdn->htn', xh, w_ref[...].astype(mxu_dtype),
                     preferred_element_type=jnp.float32)      # (H, T, 3*d_out) f32

    q = qkv[..., :d_out]                 # softmax scale already folded into W_q
    k = qkv[..., d_out:2 * d_out]
    v = qkv[..., 2 * d_out:]

    # attn_scores = queries @ keys.transpose(1, 2), batched over heads.
    # NOTE: no causal mask (the reference's masked_fill is non-in-place & discarded).
    s = jnp.einsum('hqd,hkd->hqk', q.astype(mxu_dtype), k.astype(mxu_dtype),
                   preferred_element_type=jnp.float32)        # (H, T, T) f32

    # Softmax over keys, entirely in f32 (v5e has no bf16 VPU/EUP).
    m = jnp.max(s, axis=-1, keepdims=True)
    e = jnp.exp(s - m)
    attn = e / jnp.sum(e, axis=-1, keepdims=True)             # exact divide (no approx recip)

    # context_vec = attn_weights @ values, batched over heads.
    ctx = jnp.einsum('hqk,hkd->hqd', attn.astype(mxu_dtype), v.astype(mxu_dtype),
                     preferred_element_type=jnp.float32)      # (H, T, d_out) f32

    # Direct per-head column writes (no list + concatenate epilogue). Columns
    # [h*d_out, (h+1)*d_out) hold head h, exactly torch.cat([head(x)...], -1).
    # H*d_out < 128 here -> lane-masked stores; keep H*d_out a 128-multiple at
    # production sizes (or flatten to (B, T*H*d_out) in the wrapper).
    for h in range(H):                                        # static, tiny epilogue
        o_ref[0, :, h * d_out:(h + 1) * d_out] = ctx[h].astype(o_ref.dtype)


def multi_head_attention(x, w_fused, *, mxu_dtype=jnp.float32):
    """x: (B, T, d_in) float32; w_fused: (H, d_in, 3*d_out) from fuse_weights()."""
    B, T, d_in = x.shape
    H, _, three_d_out = w_fused.shape
    d_out = three_d_out // 3
    HD = H * d_out

    kernel = functools.partial(_mha_kernel, H=H, d_out=d_out, mxu_dtype=mxu_dtype)

    return pl.pallas_call(
        kernel,
        out_shape=jax.ShapeDtypeStruct((B, T, HD), x.dtype),
        grid=(B,),
        in_specs=[
            # One batch element per grid step; (T, d_in) equals the full trailing
            # dims so the (8,128) block constraint is satisfied.
            pl.BlockSpec((1, T, d_in), lambda b: (b, 0, 0)),
            # Fused weights: constant block index -> DMA'd once, kept resident.
            pl.BlockSpec((H, d_in, three_d_out), lambda b: (0, 0, 0)),
        ],
        out_specs=pl.BlockSpec((1, T, HD), lambda b: (b, 0, 0)),
        compiler_params=pltpu.CompilerParams(
            dimension_semantics=("parallel",),  # batch shards across v7x's 2 TCs
        ),
    )(x, w_fused)


def _reference(x, wq, wk, wv):
    """Pure-JAX mirror of the PyTorch forward (per head), high-precision matmuls."""
    H, _, d_out = wq.shape
    hp = jax.lax.Precision.HIGHEST
    outs = []
    for h in range(H):
        q = jnp.einsum('btd,de->bte', x, wq[h], precision=hp)
        k = jnp.einsum('btd,de->bte', x, wk[h], precision=hp)
        v = jnp.einsum('btd,de->bte', x, wv[h], precision=hp)
        s = jnp.einsum('bqe,bke->bqk', q, k, precision=hp)
        # masked_fill in the reference is non-in-place and discarded -> no mask.
        attn = jax.nn.softmax(s / (d_out ** 0.05), axis=-1)
        outs.append(jnp.einsum('bqk,bke->bqe', attn, v, precision=hp))
    return jnp.concatenate(outs, axis=-1)


if __name__ == "__main__":
    # Small shapes consistent with the module.
    B, T, d_in, d_out, H = 2, 8, 32, 16, 4
    context_length = T        # mask buffer size in the reference (unused: mask is a no-op)
    dropout_p = 0.0           # identity dropout (eval semantics)

    key = jax.random.PRNGKey(0)
    kx, kq, kk, kv = jax.random.split(key, 4)
    x = jax.random.normal(kx, (B, T, d_in), dtype=jnp.float32)
    # Per-head "Linear" weights, (H, d_in, d_out) (== torch Linear weight transposed).
    wq = jax.random.normal(kq, (H, d_in, d_out), dtype=jnp.float32) * 0.1
    wk = jax.random.normal(kk, (H, d_in, d_out), dtype=jnp.float32) * 0.1
    wv = jax.random.normal(kv, (H, d_in, d_out), dtype=jnp.float32) * 0.1

    # Weight fusion hoisted out of the per-call path (done once, not per step).
    w_fused = fuse_weights(wq, wk, wv)

    ref = _reference(x, wq, wk, wv)

    # f32 MXU-operand path: strict numerics check (exact softmax division,
    # full-precision in-kernel matmuls -> 1e-4 tolerance restored).
    mha_f32 = jax.jit(functools.partial(multi_head_attention, mxu_dtype=jnp.float32))
    out = jax.block_until_ready(mha_f32(x, w_fused))
    assert out.shape == (B, T, H * d_out), out.shape
    assert jnp.allclose(out, ref, atol=1e-4, rtol=1e-4), "f32 kernel mismatch vs reference"

    # bf16 MXU-operand path (production-recommended: ~2-4x MXU throughput);
    # f32 accumulation + f32 softmax, so only operand-rounding error remains.
    mha_bf16 = jax.jit(functools.partial(multi_head_attention, mxu_dtype=jnp.bfloat16))
    out_bf16 = jax.block_until_ready(mha_bf16(x, w_fused))
    assert out_bf16.shape == (B, T, H * d_out), out_bf16.shape
    assert jnp.allclose(out_bf16, ref, atol=5e-2, rtol=5e-2), "bf16 kernel mismatch vs reference"

    print("KERNEL_OK")
</pallas_src>

<mosaic_0001>
module attributes {stable_mosaic.version = 11 : i64} {
  func.func @_mha_kernel(%arg0: i32, %arg1: memref<1x8x32xf32, #tpu.memory_space<vmem>>, %arg2: memref<4x32x48xf32, #tpu.memory_space<vmem>>, %arg3: memref<1x8x64xf32, #tpu.memory_space<vmem>>) attributes {dimension_semantics = [#tpu.dimension_semantics<parallel>], iteration_bounds = array<i64: 2>, scalar_prefetch = 0 : i64, scratch_operands = 0 : i64, tpu.core_type = #tpu.core_type<tc>, window_params = [{transform_indices = @transform_0, window_bounds = array<i64: 1, 8, 32>}, {pipeline_mode = #tpu.pipeline_mode<synchronous>, transform_indices = @transform_1, window_bounds = array<i64: 4, 32, 48>}, {transform_indices = @transform_2, window_bounds = array<i64: 1, 8, 64>}]} {
    %c0 = arith.constant 0 : index
    %c0_0 = arith.constant 0 : index
    %c0_1 = arith.constant 0 : index
    %0 = vector.load %arg1[%c0, %c0_0, %c0_1] : memref<1x8x32xf32, #tpu.memory_space<vmem>>, vector<1x8x32xf32>
    %1 = vector.shape_cast %0 : vector<1x8x32xf32> to vector<8x32xf32>
    %2 = vector.shape_cast %1 : vector<8x32xf32> to vector<1x8x32xf32>
    %3 = vector.broadcast %2 : vector<1x8x32xf32> to vector<4x8x32xf32>
    %c0_2 = arith.constant 0 : index
    %c0_3 = arith.constant 0 : index
    %c0_4 = arith.constant 0 : index
    %4 = vector.load %arg2[%c0_2, %c0_3, %c0_4] : memref<4x32x48xf32, #tpu.memory_space<vmem>>, vector<4x32x48xf32>
    "tpu.trace_start"() <{level = 10 : i32, message = "htd,hdn->htn"}> : () -> ()
    %cst = arith.constant dense<0.000000e+00> : vector<4x8x48xf32>
    %5 = tpu.matmul %3, %4, %cst {dimension_numbers = #tpu.dot_dimension_numbers<[2], [1], [1], [2], [0, 0, 0, 1, 1, 2], [0], [0]>} : vector<4x8x32xf32>, vector<4x32x48xf32>, vector<4x8x48xf32> -> vector<4x8x48xf32>
    "tpu.trace_stop"() : () -> ()
    %6 = vector.extract_strided_slice %5 {offsets = [0, 0, 0], sizes = [4, 8, 16], strides = [1, 1, 1]} : vector<4x8x48xf32> to vector<4x8x16xf32>
    %7 = vector.extract_strided_slice %5 {offsets = [0, 0, 16], sizes = [4, 8, 16], strides = [1, 1, 1]} : vector<4x8x48xf32> to vector<4x8x16xf32>
    %8 = vector.extract_strided_slice %5 {offsets = [0, 0, 32], sizes = [4, 8, 16], strides = [1, 1, 1]} : vector<4x8x48xf32> to vector<4x8x16xf32>
    "tpu.trace_start"() <{level = 10 : i32, message = "hqd,hkd->hqk"}> : () -> ()
    %cst_5 = arith.constant dense<0.000000e+00> : vector<4x8x8xf32>
    %9 = tpu.matmul %6, %7, %cst_5 {dimension_numbers = #tpu.dot_dimension_numbers<[2], [2], [1], [1], [0, 0, 0, 1, 1, 1], [0], [0]>} : vector<4x8x16xf32>, vector<4x8x16xf32>, vector<4x8x8xf32> -> vector<4x8x8xf32>
    "tpu.trace_stop"() : () -> ()
    %cst_6 = arith.constant dense<0xFF800000> : vector<4x8xf32>
    %10 = vector.multi_reduction <maximumf>, %9, %cst_6 [2] : vector<4x8x8xf32> to vector<4x8xf32>
    %11 = vector.shape_cast %10 : vector<4x8xf32> to vector<4x8x1xf32>
    %12 = vector.broadcast %11 : vector<4x8x1xf32> to vector<4x8x8xf32>
    %13 = arith.subf %9, %12 : vector<4x8x8xf32>
    %14 = math.exp %13 : vector<4x8x8xf32>
    %cst_7 = arith.constant dense<0.000000e+00> : vector<4x8xf32>
    %15 = vector.multi_reduction <add>, %14, %cst_7 [2] : vector<4x8x8xf32> to vector<4x8xf32>
    %16 = vector.shape_cast %15 : vector<4x8xf32> to vector<4x8x1xf32>
    %17 = vector.broadcast %16 : vector<4x8x1xf32> to vector<4x8x8xf32>
    %18 = arith.divf %14, %17 : vector<4x8x8xf32>
    "tpu.trace_start"() <{level = 10 : i32, message = "hqk,hkd->hqd"}> : () -> ()
    %cst_8 = arith.constant dense<0.000000e+00> : vector<4x8x16xf32>
    %19 = tpu.matmul %18, %8, %cst_8 {dimension_numbers = #tpu.dot_dimension_numbers<[2], [1], [1], [2], [0, 0, 0, 1, 1, 2], [0], [0]>} : vector<4x8x8xf32>, vector<4x8x16xf32>, vector<4x8x16xf32> -> vector<4x8x16xf32>
    "tpu.trace_stop"() : () -> ()
    %20 = vector.extract_strided_slice %19 {offsets = [0, 0, 0], sizes = [1, 8, 16], strides = [1, 1, 1]} : vector<4x8x16xf32> to vector<1x8x16xf32>
    %21 = vector.shape_cast %20 : vector<1x8x16xf32> to vector<8x16xf32>
    %c0_9 = arith.constant 0 : index
    %c0_10 = arith.constant 0 : index
    %c0_11 = arith.constant 0 : index
    %22 = vector.load %arg3[%c0_9, %c0_10, %c0_11] : memref<1x8x64xf32, #tpu.memory_space<vmem>>, vector<1x8x16xf32>
    %23 = vector.shape_cast %22 : vector<1x8x16xf32> to vector<8x16xf32>
    %24 = vector.shape_cast %21 : vector<8x16xf32> to vector<1x8x16xf32>
    tpu.vector_store %arg3[%c0_9, %c0_10, %c0_11], %24 {strides = array<i32>} : memref<1x8x64xf32, #tpu.memory_space<vmem>>, vector<1x8x16xf32>,
    %25 = vector.extract_strided_slice %19 {offsets = [1, 0, 0], sizes = [1, 8, 16], strides = [1, 1, 1]} : vector<4x8x16xf32> to vector<1x8x16xf32>
    %26 = vector.shape_cast %25 : vector<1x8x16xf32> to vector<8x16xf32>
    %c0_12 = arith.constant 0 : index
    %c0_13 = arith.constant 0 : index
    %c16 = arith.constant 16 : index
    %27 = vector.load %arg3[%c0_12, %c0_13, %c16] : memref<1x8x64xf32, #tpu.memory_space<vmem>>, vector<1x8x16xf32>
    %28 = vector.shape_cast %27 : vector<1x8x16xf32> to vector<8x16xf32>
    %29 = vector.shape_cast %26 : vector<8x16xf32> to vector<1x8x16xf32>
    tpu.vector_store %arg3[%c0_12, %c0_13, %c16], %29 {strides = array<i32>} : memref<1x8x64xf32, #tpu.memory_space<vmem>>, vector<1x8x16xf32>,
    %30 = vector.extract_strided_slice %19 {offsets = [2, 0, 0], sizes = [1, 8, 16], strides = [1, 1, 1]} : vector<4x8x16xf32> to vector<1x8x16xf32>
    %31 = vector.shape_cast %30 : vector<1x8x16xf32> to vector<8x16xf32>
    %c0_14 = arith.constant 0 : index
    %c0_15 = arith.constant 0 : index
    %c32 = arith.constant 32 : index
    %32 = vector.load %arg3[%c0_14, %c0_15, %c32] : memref<1x8x64xf32, #tpu.memory_space<vmem>>, vector<1x8x16xf32>
    %33 = vector.shape_cast %32 : vector<1x8x16xf32> to vector<8x16xf32>
    %34 = vector.shape_cast %31 : vector<8x16xf32> to vector<1x8x16xf32>
    tpu.vector_store %arg3[%c0_14, %c0_15, %c32], %34 {strides = array<i32>} : memref<1x8x64xf32, #tpu.memory_space<vmem>>, vector<1x8x16xf32>,
    %35 = vector.extract_strided_slice %19 {offsets = [3, 0, 0], sizes = [1, 8, 16], strides = [1, 1, 1]} : vector<4x8x16xf32> to vector<1x8x16xf32>
    %36 = vector.shape_cast %35 : vector<1x8x16xf32> to vector<8x16xf32>
    %c0_16 = arith.constant 0 : index
    %c0_17 = arith.constant 0 : index
    %c48 = arith.constant 48 : index
    %37 = vector.load %arg3[%c0_16, %c0_17, %c48] : memref<1x8x64xf32, #tpu.memory_space<vmem>>, vector<1x8x16xf32>
    %38 = vector.shape_cast %37 : vector<1x8x16xf32> to vector<8x16xf32>
    %39 = vector.shape_cast %36 : vector<8x16xf32> to vector<1x8x16xf32>
    tpu.vector_store %arg3[%c0_16, %c0_17, %c48], %39 {strides = array<i32>} : memref<1x8x64xf32, #tpu.memory_space<vmem>>, vector<1x8x16xf32>,
    return
  }
  func.func @transform_0(%arg0: i32) -> (i32, i32, i32) {
    %c0_i32 = arith.constant 0 : i32
    %c0_i32_0 = arith.constant 0 : i32
    %c0_i32_1 = arith.constant 0 : i32
    return %arg0, %c0_i32, %c0_i32_0 : i32, i32, i32
  }
  func.func @transform_1(%arg0: i32) -> (i32, i32, i32) {
    %c0_i32 = arith.constant 0 : i32
    %c0_i32_0 = arith.constant 0 : i32
    %c0_i32_1 = arith.constant 0 : i32
    %c0_i32_2 = arith.constant 0 : i32
    return %c0_i32, %c0_i32_0, %c0_i32_1 : i32, i32, i32
  }
  func.func @transform_2(%arg0: i32) -> (i32, i32, i32) {
    %c0_i32 = arith.constant 0 : i32
    %c0_i32_0 = arith.constant 0 : i32
    %c0_i32_1 = arith.constant 0 : i32
    return %arg0, %c0_i32, %c0_i32_0 : i32, i32, i32
  }
}

</mosaic_0001>

<bundles_post_ra>
// kernel: multi_head_attention.1
= control target key start
LH: loop header
LB: loop body
LE: loop exit
PB: predicated region body
PF: predicated region fallthrough
CT: control target
= control target key end

     0   :  { %7 = vsyncpa [#allocation3], 0  ;;  %s1885_s0 = inlined_call_operand.hbm [shape: f32[2,8,32], index: 0, kind: input, shape index: {}]   ;;  %s1886_s1 = inlined_call_operand.hbm [shape: f32[4,32,48], index: 1, kind: input, shape index: {}]   ;;  %s1887_s2 = inlined_call_operand.hbm [shape: f32[2,8,64], index: 2, kind: output, shape index: {}]  }
   0x1   :  { %9 = vsyncpa [#allocation3 + $0x1], 0 }
   0x2   :  { %10 = vsyncpa [#allocation6], 0 }
   0x3   :  { %11 = vsyncpa [#allocation4], 0 }
   0x4   :  { %13 = vsyncpa [#allocation4 + $0x1], 0  ;;  %s1629_s9 = smov 0   ;;  %s1631_s10 = smov 0  }
   0x5   :  { %s1633_s11 = smov 0   ;;  %s1635_s12 = smov 0  }
   0x6 LB: > { %s1650_s13 = sadd.s32 4294967295, %s1600_s12   ;;  %s1246_s14 = sadd.s32 4294967294, %s1600_s12   ;;  %s1600_s12 = sphi %s1635_s12, %s1909_s12   ;;  %s1596_s11 = sphi %s1633_s11, %s1908_s11   ;;  %s1592_s10 = sphi %s1631_s10, %s1907_s10   ;;  %s1588_s9 = sphi %s1629_s9, %s1906_s9  }
   0x7   : > { %p39_p0 = scmp.ne.s32.totalorder %s1592_s10, %s1588_s9  ;;  %p1888_p1 = scmp.eq.s32.totalorder %s1650_s13, 0 }
   0x8   : > { %p90_p3 = scmp.eq.s32.totalorder %s1246_s14, 1  ;;  %p1247_p5 = scmp.ge.s32.totalorder %s1600_s12, 1 }
   0x9   : > { %p1659_p4 = por %p1888_p1, %p39_p0  ;;  %p97_p7 = scmp.lt.s32.totalorder %s1600_s12, 3 }
   0xa   : > { %p1664_p6 = por %p90_p3, %p39_p0  ;;  %s1602_s18 = smov [#allocation5]  }
   0xb   : > { %s1892_s15 = scalar_select %p1659_p4, 1, 0 }
   0xc   : > { %s1893_s16 = scalar_select %p1664_p6, 1, 0 }
   0xd   : > { %p1669_p8 = pnand %p1247_p5, %p97_p7  ;;  %s109_s19 = sshll.u32 %s1602_s18, 4  ;;  %s110_s19 = int_to_ptr.vmem [resolvable:$true] %s109_s19 }
   0xe   : > { %s1683_s21 = sadd.s32 1, %s1600_s12   ;;  %s26_s22 = sadd.s32 1, %s1596_s11 }
   0xf   : > { %s1894_s17 = scalar_select %p1669_p8, 1, 0 }
  0x10   : > { %p1404_p9 = pneg %p1669_p8  ;;  %s23_s23 = ssub.s32 %s1600_s12, %s1683_s21 }
  0x11   : > { %s1489_s24 = scalar_lea.vmem %s110_s19, 2048  ;;  %p1497_p5 = scmp.lt.s32.totalorder %s110_s19, %s110_s19 }
  0x12   : > { %p1678_p11 = pnand %p1404_p9, %p1888_p1  ;;  %p1490_p13 = scmp.ne.s32.totalorder %s110_s19, %s1489_s24 }
  0x13   : > { %p1498_p7 = scmp.lt.s32.totalorder %s1489_s24, %s1489_s24 }
  0x14   : > { %p1480_p12 = pneg %p1678_p11 }
  0x15   : > { %p1499_p10 = por %p1498_p7, %p1497_p5 }
  0x16   : > { %p1492_p0 = pnand %p1490_p13, %p1480_p12 }
  0x18   : > { %p1493_p3 = pneg %p1492_p0 }
  0x1a   : > { %p1500_p2 = pnand %p1499_p10, %p1493_p3 }
  0x1c   : > { %1503 = shalt.err (!%p1500_p2)
}
  0x1d   : > { %s1603_s25 = smov 128   ;;  %s1604_s26 = smov 8  }
  0x1e   : > { %1407 = dma.hbm_to_vmem [thread:$0]  (!%p1678_p11), %s1886_s1, 2048, %s110_s19, [#allocation6], %s1603_s25, %s1603_s25, %s1604_s26  }
  0x1f   : > { %p24_p9 = scmp.eq.s32.totalorder %s23_s23, 0  ;;  %p33_p12 = scmp.ne.s32.totalorder %s1596_s11, %s1592_s10 }
  0x20   : > { %p34_p10 = scmp.eq.s32.totalorder %s1600_s12, 0  ;;  %p1417_p2 = scmp.lt.s32.totalorder %s1600_s12, 2 }
  0x21   : > { %s1700_s29 = scalar_select %p24_p9, %s1596_s11, %s26_s22  }
  0x22   : > { %p35_p13 = por %p34_p10, %p33_p12  ;;  %p1896_p0 = scmp.eq.s32.totalorder %s1650_s13, 1 }
  0x23   : > { %s123_s3 = sand.u32 1, %s1596_s11   ;;  %s1251_s4 = sshll.u32 %s1600_s12, 7 }
  0x24   : > { %p1704_p3 = por %p1896_p0, %p33_p12  ;;  %s1250_s5 = sshll.u32 %s123_s3, 3 }
  0x25   : > { %s1713_s8 = scalar_lea.hbm %s1885_s0, %s1251_s4  ;;  %s127_s14 = scalar_lea.vmem [#allocation2], %s1250_s5 }
  0x26   : > { %s1897_s30 = scalar_select %p1704_p3, 1, 0 }
  0x27   : > { %s134_s18 = sshll.u32 %s127_s14, 4  ;;  %p1715_p11 = pnand %p1417_p2, %p35_p13  ;;  %s135_s18 = int_to_ptr.vmem [resolvable:$true] %s134_s18 }
  0x28   : > { %s124_s20 = scalar_lea.sflag [#allocation3], %s123_s3  ;;  %s1504_s22 = scalar_lea.hbm %s1713_s8, 128 }
  0x29   : > { %p1505_p5 = scmp.ne.s32.totalorder %s1713_s8, %s1504_s22  ;;  %p1506_p7 = pneg %p1715_p11 }
  0x2a   : > { %s1509_s25 = scalar_lea.hbm %s1885_s0, 256  ;;  %p1510_p10 = scmp.lt.s32.totalorder %s1713_s8, %s1885_s0 }
  0x2b   : > { %p1507_p9 = pnand %p1506_p7, %p1505_p5  ;;  %p1511_p2 = scmp.lt.s32.totalorder %s1509_s25, %s1504_s22 }
  0x2d   : > { %p1508_p12 = pneg %p1507_p9  ;;  %p1512_p13 = por %p1511_p2, %p1510_p10 }
  0x2f   : > { %p1513_p0 = pnand %p1512_p13, %p1508_p12 }
  0x31   : > { %1516 = shalt.err (!%p1513_p0)
}
  0x32   : > { %s1517_s28 = scalar_lea.vmem %s135_s18, 128  ;;  %s1605_s3 = smov [#allocation2]  }
  0x33   : > { %p1518_p1 = scmp.ne.s32.totalorder %s135_s18, %s1517_s28  ;;  %s1522_s4 = sshll.u32 %s1605_s3, 4  ;;  %s1523_s4 = int_to_ptr.vmem [resolvable:$false] %s1522_s4 }
  0x34   : > { %s1524_s5 = scalar_lea.vmem %s1523_s4, 256  ;;  %p1525_p5 = scmp.lt.s32.totalorder %s135_s18, %s1523_s4 }
  0x35   : > { %p1520_p6 = pnand %p1518_p1, %p1506_p7  ;;  %p1526_p9 = scmp.lt.s32.totalorder %s1524_s5, %s1517_s28 }
  0x37   : > { %p1521_p3 = pneg %p1520_p6  ;;  %p1527_p4 = por %p1526_p9, %p1525_p5 }
  0x39   : > { %p1528_p8 = pnand %p1527_p4, %p1521_p3 }
  0x3b   : > { %1531 = shalt.err (!%p1528_p8)
}
  0x3c   : > { %1411 = dma.hbm_to_vmem [thread:$0]  (!%p1715_p11), %s1713_s8, 128, %s135_s18, %s124_s20  }
  0x3d   : > { %p1899_p12 = scmp.ne.s32.totalorder %s1894_s17, 0 }
  0x3e   : > { %s1736_s6 = sand.u32 (!%p1899_p12), 1, %s1592_s10   ;;  %p1900_p1 = scmp.ne.s32.totalorder (!%p1899_p12), %s1892_s15, 0 }
  0x3f   : > { %143 = sbr.rel (%p1899_p12) target bundleno = 1231 (0x4cf), region = 28  ;;  %s1253_s7 = sshll.u32 (!%p1899_p12), %s1736_s6, 3 }
  0x40   : > { %s146_s14 = scalar_lea.sflag (!%p1899_p12), [#allocation3], %s1736_s6  ;;  %s149_s22 = scalar_lea.vmem (!%p1899_p12), [#allocation2], %s1253_s7 }
  0x44   : > { %1575 = dma.done.wait (%p1900_p1), %s146_s14, 128  }
  0x45   : > { %1577 = vsyncadd (%p1900_p1), %s146_s14, 4294967168  ;;  %p1901_p4 = scmp.eq.s32.totalorder %s1650_s13, 0 }
  0x47   : > { %1579 = dma.done.wait (%p1901_p4), [#allocation6], 2048   ;;  %p1902_p6 = pmov %p1901_p4 }
  0x48   : > { %v1606_v0 = vmov 0.0   ;;  %vm1607_vm0 = vmmov 0   ;;  %v178_v1 = vld [vmem:[#allocation5 + $0x18] sm:$0xff]  ;;  %v177_v2 = vld [vmem:[#allocation5 + $0x10] sm:$0xff]  ;;  %v176_v5 = vld [vmem:[#allocation5 + $0x8] sm:$0xff]  ;;  %vm191_vm1 = vcmask 261120  }
  0x49   : > { %1581 = vsyncadd (%p1902_p6), [#allocation6], 4294965248  ;;  %1312 = vmatprep.subr.mxu0 %v1606_v0  ;;  %1323 = vmatprep.subr.mxu1 %v1606_v0  ;;  %v182_v3 = vld [vmem:[#allocation5 + $0x38] sm:$0xff]  ;;  %v181_v4 = vld [vmem:[#allocation5 + $0x30] sm:$0xff]  ;;  %s1608_s15 = smov 112   ;;  %vm478_vm2 = vcmask 130048  }
  0x4a   : > { %1320 = vmatprep.mubr.msk.f32.mxu0 %vm1607_vm0, %v1606_v0  ;;  %1331 = vmatprep.mubr.msk.f32.mxu1 %vm1607_vm0, %v1606_v0  ;;  %v180_v6 = vld [vmem:[#allocation5 + $0x28] sm:$0xff]  ;;  %v175_v7 = vld [vmem:[#allocation5] sm:$0xff]  ;;  %v174_v9 = vld [vmem:[%s149_s22] sm:$0xff]  ;;  %vm784_vm3 = vcmask 64512   ;;  %s1609_s17 = smov 96   ;;  %s173_s8 = scalar_lea.vmem [#allocation7], %s1253_s7 }
  0x4b   : > { %1313 = vmatpush3.msra.mxu0 %v178_v1  ;;  %1324 = vmatpush3.msra.mxu1 %v182_v3  ;;  %v179_v8 = vld [vmem:[#allocation5 + $0x20] sm:$0xff]  ;;  %v186_v10 = vld [vmem:[#allocation5 + $0x58] sm:$0xff]  ;;  %v185_v11 = vld [vmem:[#allocation5 + $0x50] sm:$0xff]  ;;  %s1610_s18 = smov 16   ;;  %s1611_s19 = smov 32   ;;  %vm1138_vm4 = vcmask 261248  }
  0x4c   : > { %1314 = vmatprep.subr.mxu0 %v1606_v0  ;;  %1325 = vmatprep.subr.mxu1 %v1606_v0  ;;  %v190_v12 = vld [vmem:[#allocation5 + $0x78] sm:$0xff]  ;;  %v184_v13 = vld [vmem:[#allocation5 + $0x48] sm:$0xff]  ;;  %v189_v14 = vld [vmem:[#allocation5 + $0x70] sm:$0xff]  ;;  %s1612_s20 = smov 48   ;;  %vm1144_vm5 = vcmask 392448   ;;  %s1273_s23 = sshll.u32 %s1650_s13, 7 }
  0x4d   : > { %1315 = vmatpush3.msra.mxu0 %v177_v2  ;;  %1326 = vmatpush3.msra.mxu1 %v181_v4  ;;  %v183_v15 = vld [vmem:[#allocation5 + $0x40] sm:$0xff]  ;;  %v188_v16 = vld [vmem:[#allocation5 + $0x68] sm:$0xff]  ;;  %s1166_s24 = sshll.u32 %s173_s8, 4  ;;  %vm1150_vm6 = vcmask 523648   ;;  %s1848_s27 = scalar_lea.hbm %s1887_s2, %s1273_s23  ;;  %s1167_s24 = int_to_ptr.vmem [resolvable:$true] %s1166_s24 }
  0x4e   : > { %1316 = vmatprep.subr.mxu0 %v1606_v0  ;;  %1327 = vmatprep.subr.mxu1 %v1606_v0  ;;  %v187_v17 = vld [vmem:[#allocation5 + $0x60] sm:$0xff]  ;;  %s1153_s28 = scalar_lea.sflag [#allocation4], %s1736_s6  ;;  %s1532_s3 = scalar_lea.vmem %s1167_s24, 128 }
  0x4f   : > { %1317 = vmatpush3.msra.mxu0 %v176_v5  ;;  %1328 = vmatpush3.msra.mxu1 %v180_v6  ;;  %p1533_p8 = scmp.ne.s32.totalorder %s1167_s24, %s1532_s3  ;;  %p1903_p3 = scmp.ne.s32.totalorder %s1897_s30, 0 }
  0x50   : > { %1318 = vmatprep.subr.mxu0 %v1606_v0  ;;  %1329 = vmatprep.subr.mxu1 %v1606_v0  ;;  %s1613_s4 = smov [#allocation7]  }
  0x51   : > { %1319 = vmatpush3.msra.mxu0 %v175_v7  ;;  %1330 = vmatpush3.msra.mxu1 %v179_v8  ;;  %p1534_p11 = pnand %p1533_p8, %p1903_p3  ;;  %s1536_s5 = sshll.u32 %s1613_s4, 4  ;;  %s1537_s5 = int_to_ptr.vmem [resolvable:$false] %s1536_s5 }
  0x52   : > { %1321 = vmatmul.mubr.msk.f32.vlgmr.msra.gmra.mxu0 %vm191_vm1, %v174_v9  ;;  %1334 = vmatprep.subr.mxu0 %v1606_v0  ;;  %s1538_s13 = scalar_lea.vmem %s1537_s5, 256  ;;  %p1539_p10 = scmp.lt.s32.totalorder %s1167_s24, %s1537_s5 }
  0x53   : > { %1335 = vmatpush3.msra.mxu0 %v186_v10  ;;  %1345 = vmatprep.subr.mxu1 %v1606_v0  ;;  %p1535_p7 = pneg %p1534_p11  ;;  %p1540_p2 = scmp.lt.s32.totalorder %s1538_s13, %s1532_s3 }
  0x54   : > { %1336 = vmatprep.subr.mxu0 %v1606_v0  ;;  %1332 = vmatmul.mubr.msk.f32.vlgmr.msra.gmra.mxu1 %vm191_vm1, %v174_v9 }
  0x55   : > { %1337 = vmatpush3.msra.mxu0 %v185_v11  ;;  %1346 = vmatpush3.msra.mxu1 %v190_v12  ;;  %p1541_p13 = por %p1540_p2, %p1539_p10 }
  0x56   : > { %1338 = vmatprep.subr.mxu0 %v1606_v0  ;;  %1347 = vmatprep.subr.mxu1 %v1606_v0 }
  0x57   : > { %1339 = vmatpush3.msra.mxu0 %v184_v13  ;;  %1348 = vmatpush3.msra.mxu1 %v189_v14  ;;  %p1542_p0 = pnand %p1541_p13, %p1535_p7 }
  0x58   : > { %1340 = vmatprep.subr.mxu0 %v1606_v0  ;;  %1349 = vmatprep.subr.mxu1 %v1606_v0 }
  0x59   : > { %1341 = vmatpush3.msra.mxu0 %v183_v15  ;;  %1342 = vmatprep.mubr.msk.f32.mxu0 %vm1607_vm0, %v1606_v0 }
  0x5a   : > { %1350 = vmatpush3.msra.mxu1 %v188_v16  ;;  %1343 = vmatmul.mubr.msk.f32.vlgmr.msra.gmra.mxu0 %vm191_vm1, %v174_v9 }
  0x5b   : > { %1351 = vmatprep.subr.mxu1 %v1606_v0  ;;  %1353 = vmatprep.mubr.msk.f32.mxu1 %vm1607_vm0, %v1606_v0 }
  0x5c   : > { %1352 = vmatpush3.msra.mxu1 %v187_v17  ;;  %1356 = vmatprep.subr.mxu0 %v1606_v0 }
  0x5d   : > { %1354 = vmatmul.mubr.msk.f32.vlgmr.msra.gmra.mxu1 %vm191_vm1, %v174_v9  ;;  %1358 = vmatprep.mubr.msk.f32.mxu0 %vm1607_vm0, %v1606_v0 }
  0x5e   : > { %1361 = vmatprep.subr.mxu1 %v1606_v0  ;;  %1363 = vmatprep.mubr.msk.f32.mxu1 %vm1607_vm0, %v1606_v0 }
 0x112   : > { %v261_v18 = vpop.f32.mrf.mxu0 }
 0x113   : > { %476 = vrot.lane.b32.xlu0 %v261_v18, %s1608_s15 }
 0x114   : > { %v1322_v19 = vpop.f32.mrf.mxu0  ;;  %v1784_v20 = vpop.f32.mrf.mxu1 }
 0x116   : > { %v1333_v21 = vpop.f32.mrf.mxu1 }
 0x117   : > { %554 = vrot.lane.b32.xlu0 %v1784_v20, %s1608_s15 }
 0x11a   : > { %v1787_v22 = vpop.f32.mrf.mxu0 }
 0x11b   : > { %631 = vrot.lane.b32.xlu1 %v1787_v22, %s1608_s15 }
 0x11c   : > { %v1344_v23 = vpop.f32.mrf.mxu0 }
 0x11d   : > { %v1790_v24 = vpop.f32.mrf.mxu1 }
 0x11f   : > { %v1355_v25 = vpop.f32.mrf.mxu1  ;;  %708 = vrot.lane.b32.xlu1 %v1790_v24, %s1608_s15 }
 0x185   : > { %v477_v26 = vpop.permute.xlu0 %476 }
 0x186   : > { %1357 = vmatpush3.xpose.msk.msra.mxu0 %vm478_vm2, %v477_v26 }
 0x187   : > { %1366 = vmatprep.subr.mxu0 %v1606_v0 }
 0x189   : > { %1359 = vmatmul.mubr.msk.f32.vlgmr.msra.gmra.mxu0 %vm478_vm2, %v261_v18  ;;  %v555_v27 = vpop.permute.xlu0 %554 }
 0x18a   : > { %1362 = vmatpush3.xpose.msk.msra.mxu1 %vm478_vm2, %v555_v27  ;;  %1368 = vmatprep.mubr.msk.f32.mxu0 %vm1607_vm0, %v1606_v0 }
 0x18b   : > { %1371 = vmatprep.subr.mxu1 %v1606_v0 }
 0x18d   : > { %1364 = vmatmul.mubr.msk.f32.vlgmr.msra.gmra.mxu1 %vm478_vm2, %v1784_v20  ;;  %v632_v28 = vpop.permute.xlu1 %631 }
 0x18e   : > { %1367 = vmatpush3.xpose.msk.msra.mxu0 %vm478_vm2, %v632_v28  ;;  %1373 = vmatprep.mubr.msk.f32.mxu1 %vm1607_vm0, %v1606_v0 }
 0x18f   : > { %1376 = vmatprep.subr.mxu0 %v1606_v0 }
 0x191   : > { %1369 = vmatmul.mubr.msk.f32.vlgmr.msra.gmra.mxu0 %vm478_vm2, %v1787_v22  ;;  %v709_v29 = vpop.permute.xlu1 %708 }
 0x192   : > { %1372 = vmatpush3.xpose.msk.msra.mxu1 %vm478_vm2, %v709_v29  ;;  %1378 = vmatprep.mubr.msk.f32.mxu0 %vm1607_vm0, %v1606_v0 }
 0x193   : > { %1381 = vmatprep.subr.mxu1 %v1606_v0 }
 0x195   : > { %1374 = vmatmul.mubr.msk.f32.vlgmr.msra.gmra.mxu1 %vm478_vm2, %v1790_v24 }
 0x196   : > { %1383 = vmatprep.mubr.msk.f32.mxu1 %vm1607_vm0, %v1606_v0 }
 0x249   : > { %v549_v30 = vpop.f32.mrf.mxu0 }
 0x24a   : > { %v785_v31 = vsel %vm784_vm3, %v549_v30, -inf }
 0x24b   : > { %786 = vmax.xlane.f32.xlu0 %v785_v31  ;;  %v1360_v32 = vpop.f32.mrf.mxu0 }
 0x24d   : > { %v626_v33 = vpop.f32.mrf.mxu1 }
 0x24e   : > { %v788_v34 = vsel %vm784_vm3, %v626_v33, -inf }
 0x24f   : > { %v1365_v35 = vpop.f32.mrf.mxu1  ;;  %789 = vmax.xlane.f32.xlu1 %v788_v34 }
 0x251   : > { %v703_v36 = vpop.f32.mrf.mxu0 }
 0x252   : > { %v791_v37 = vsel %vm784_vm3, %v703_v36, -inf }
 0x253   : > { %792 = vmax.xlane.f32.xlu0 %v791_v37  ;;  %v1370_v38 = vpop.f32.mrf.mxu0 }
 0x255   : > { %v780_v39 = vpop.f32.mrf.mxu1 }
 0x256   : > { %v794_v40 = vsel %vm784_vm3, %v780_v39, -inf }
 0x257   : > { %v1375_v41 = vpop.f32.mrf.mxu1  ;;  %795 = vmax.xlane.f32.xlu0 %v794_v40 }
 0x260   : > { %829 = vrot.lane.b32.xlu1 %v261_v18, %s1609_s17 }
 0x2d4   : > { %v787_v42 = vpop.xlane.xlu0 %786 }
 0x2d5   : > { %v797_v43 = vsub.f32 %v549_v30, %v787_v42 }
 0x2d7   : > { %v801_v44 = vmul.f32 1.442695, %v797_v43 }
 0x2d8   : > { %v790_v45 = vpop.xlane.xlu1 %789 }
 0x2d9   : > { %1462 = vpow2.f32 %v801_v44  ;;  %v798_v46 = vsub.f32 %v626_v33, %v790_v45 }
 0x2db   : > { %v803_v47 = vmul.f32 1.442695, %v798_v46 }
 0x2dc   : > { %v830_v48 = vpop.permute.xlu1 %829  ;;  %v793_v49 = vpop.xlane.xlu0 %792 }
 0x2dd   : > { %1464 = vpow2.f32 %v803_v47  ;;  %v799_v50 = vsub.f32 %v703_v36, %v793_v49  ;;  %1377 = vmatpush3.msra.mxu0 %v830_v48 }
 0x2de   : > { %1386 = vmatprep.subr.mxu0 %v1606_v0 }
 0x2df   : > { %v805_v51 = vmul.f32 1.442695, %v799_v50 }
 0x2e0   : > { %v796_v52 = vpop.xlane.xlu0 %795 }
 0x2e1   : > { %1466 = vpow2.f32 %v805_v51  ;;  %v800_v53 = vsub.f32 %v780_v39, %v796_v52 }
 0x2e3   : > { %v807_v54 = vmul.f32 1.442695, %v800_v53 }
 0x2e5   : > { %1468 = vpow2.f32 %v807_v54 }
 0x2e6   : > { %v1463_v55 = vpop.eup %1462 }
 0x2e7   : > { %v809_v56 = vsel %vm784_vm3, %v1463_v55, 0.0 }
 0x2e8   : > { %810 = vadd.xlane.f32.xlu1 %v809_v56 }
 0x2ea   : > { %v1465_v57 = vpop.eup %1464 }
 0x2eb   : > { %v812_v58 = vsel %vm784_vm3, %v1465_v57, 0.0 }
 0x2ec   : > { %813 = vadd.xlane.f32.xlu0 %v812_v58 }
 0x2ee   : > { %v1467_v59 = vpop.eup %1466 }
 0x2ef   : > { %v815_v60 = vsel %vm784_vm3, %v1467_v59, 0.0 }
 0x2f0   : > { %816 = vadd.xlane.f32.xlu1 %v815_v60 }
 0x2f2   : > { %v1469_v61 = vpop.eup %1468 }
 0x2f3   : > { %v818_v62 = vsel %vm784_vm3, %v1469_v61, 0.0 }
 0x2f4   : > { %819 = vadd.xlane.f32.xlu0 %v818_v62 }
 0x301   : > { %981 = vrot.lane.b32.xlu1 %v1787_v22, %s1609_s17 }
 0x305   : > { %1057 = vrot.lane.b32.xlu1 %v1790_v24, %s1609_s17 }
 0x30a   : > { %905 = vrot.lane.b32.xlu0 %v1784_v20, %s1609_s17 }
 0x371   : > { %v811_v63 = vpop.xlane.xlu1 %810 }
 0x372   : > { %1470 = vrcp.f32 %v811_v63 }
 0x375   : > { %v814_v1 = vpop.xlane.xlu0 %813 }
 0x376   : > { %1472 = vrcp.f32 %v814_v1 }
 0x379   : > { %v817_v2 = vpop.xlane.xlu1 %816 }
 0x37a   : > { %1474 = vrcp.f32 %v817_v2 }
 0x37d   : > { %v820_v3 = vpop.xlane.xlu0 %819  ;;  %v982_v5 = vpop.permute.xlu1 %981 }
 0x37e   : > { %1476 = vrcp.f32 %v820_v3 }
 0x37f   : > { %v1471_v4 = vpop.eup %1470 }
 0x380   : > { %v822_v6 = vmul.f32 %v1471_v4, %v1463_v55 }
 0x381   : > { %v906_v7 = vpop.permute.xlu0 %905  ;;  %v1058_v10 = vpop.permute.xlu1 %1057 }
 0x382   : > { %1379 = vmatmul.mubr.msk.f32.vlgmr.msra.gmra.mxu0 %vm784_vm3, %v822_v6  ;;  %1382 = vmatpush3.msra.mxu1 %v906_v7 }
 0x383   : > { %v1473_v8 = vpop.eup %1472  ;;  %1387 = vmatpush3.msra.mxu0 %v982_v5  ;;  %1391 = vmatprep.subr.mxu1 %v1606_v0 }
 0x384   : > { %v824_v9 = vmul.f32 %v1473_v8, %v1465_v57  ;;  %1388 = vmatprep.mubr.msk.f32.mxu0 %vm1607_vm0, %v1606_v0 }
 0x386   : > { %1384 = vmatmul.mubr.msk.f32.vlgmr.msra.gmra.mxu1 %vm784_vm3, %v824_v9 }
 0x387   : > { %v1475_v11 = vpop.eup %1474  ;;  %1392 = vmatpush3.msra.mxu1 %v1058_v10  ;;  %1393 = vmatprep.mubr.msk.f32.mxu1 %vm1607_vm0, %v1606_v0 }
 0x388   : > { %v826_v12 = vmul.f32 %v1475_v11, %v1467_v59 }
 0x38a   : > { %1389 = vmatmul.mubr.msk.f32.vlgmr.msra.gmra.mxu0 %vm784_vm3, %v826_v12 }
 0x38b   : > { %v1477_v13 = vpop.eup %1476 }
 0x38c   : > { %v828_v14 = vmul.f32 %v1477_v13, %v1469_v61 }
 0x38e   : > { %1394 = vmatmul.mubr.msk.f32.vlgmr.msra.gmra.mxu1 %vm784_vm3, %v828_v14 }
 0x442   : > { %v901_v15 = vpop.f32.mrf.mxu0 }
 0x443   : > { %1133 = vst.msk [vmem:[%s173_s8] sm:$0xff] %vm478_vm2, %v901_v15 }
 0x444   : > { %v1380_v16 = vpop.f32.mrf.mxu0 }
 0x446   : > { %v977_v17 = vpop.f32.mrf.mxu1 }
 0x447   : > { %1135 = vrot.lane.b32.xlu0 %v977_v17, %s1610_s18 }
 0x448   : > { %v1385_v18 = vpop.f32.mrf.mxu1 }
 0x44a   : > { %v1053_v19 = vpop.f32.mrf.mxu0 }
 0x44b   : > { %1141 = vrot.lane.b32.xlu1 %v1053_v19, %s1611_s19 }
 0x44c   : > { %v1390_v0 = vpop.f32.mrf.mxu0 }
 0x44e   : > { %v1129_v20 = vpop.f32.mrf.mxu1 }
 0x44f   : > { %1147 = vrot.lane.b32.xlu0 %v1129_v20, %s1612_s20 }
 0x450   : > { %v1395_v21 = vpop.f32.mrf.mxu1 }
 0x4b9   : > { %v1136_v22 = vpop.permute.xlu0 %1135 }
 0x4ba   : > { %1139 = vst.msk [vmem:[%s173_s8] sm:$0xff] %vm1138_vm4, %v1136_v22 }
 0x4bd   : > { %v1142_v23 = vpop.permute.xlu1 %1141 }
 0x4be   : > { %1145 = vst.msk [vmem:[%s173_s8] sm:$0xff] %vm1144_vm5, %v1142_v23 }
 0x4c1   : > { %v1148_v24 = vpop.permute.xlu0 %1147 }
 0x4c2   : > { %1151 = vst.msk [vmem:[%s173_s8] sm:$0xff] %vm1150_vm6, %v1148_v24 }
 0x4c3   : > { %1545 = shalt.err (!%p1542_p0)
}
 0x4c4   : > { %s1546_s7 = scalar_lea.hbm %s1848_s27, 128  ;;  %s1550_s22 = scalar_lea.hbm %s1887_s2, 256 }
 0x4c5   : > { %p1547_p5 = scmp.ne.s32.totalorder %s1848_s27, %s1546_s7  ;;  %p1551_p1 = scmp.lt.s32.totalorder %s1848_s27, %s1887_s2 }
 0x4c6   : > { %p1552_p4 = scmp.lt.s32.totalorder %s1550_s22, %s1546_s7 }
 0x4c7   : > { %p1548_p9 = pnand %p1547_p5, %p1903_p3 }
 0x4c8   : > { %p1553_p6 = por %p1552_p4, %p1551_p1 }
 0x4c9   : > { %p1549_p12 = pneg %p1548_p9 }
 0x4cb   : > { %p1554_p8 = pnand %p1553_p6, %p1549_p12 }
 0x4cd   : > { %1557 = shalt.err (!%p1554_p8)
}
 0x4ce   : > { %1402 = dma.vmem_to_hbm [thread:$0]  (%p1903_p3), %s1167_s24, 128, %s1848_s27, %s1153_s28  }
 0x4cf PF: > { %s1178_s8 = sand.u32 1, %s1588_s9   ;;  %p1904_p11 = scmp.ne.s32.totalorder %s1893_s16, 0 }
 0x4d0   : > { %p1905_p7 = scmp.ge.s32.totalorder %s1600_s12, 2  ;;  %s1179_s18 = scalar_lea.sflag [#allocation4], %s1178_s8 }
 0x4d2   : > { %p1413_p10 = pnand %p1905_p7, %p1904_p11 }
 0x4d4   : > { %p1414_p2 = pneg %p1413_p10 }
 0x4d6   : > { %1583 = dma.done.wait (%p1414_p2), %s1179_s18, 128  }
 0x4d7   : > { %1585 = vsyncadd (%p1414_p2), %s1179_s18, 4294967168  ;;  %p16_p13 = scmp.ge.s32.totalorder %s1683_s21, 4   ;;  %s1906_s9 = smov %s1592_s10 }
 0x4d8   : > { %s1907_s10 = smov %s1596_s11  ;;  %s1908_s11 = smov %s1700_s29 }
 0x4d9   : > { %s1909_s12 = smov %s1683_s21  ;;  %18 = sbr.rel (!%p16_p13) target bundleno = 6 (0x6), region = 77 }
 0x4de   :  { %1184 = vsyncpa [#allocation3], 1 }
 0x4df   :  { %1186 = vsyncpa [#allocation3 + $0x1], 1 }
 0x4e0   :  { %1187 = vsyncpa [#allocation6], 1 }
 0x4e1   :  { %1188 = vsyncpa [#allocation4], 1 }
 0x4e2   :  { %1190 = vsyncpa [#allocation4 + $0x1], 1 }

</bundles_post_ra>
